<compile_context>
chip_gen: v7x
topology: tpu7x:2x2x1
jax: 0.10.0
libtpu: 0.0.40
codegen_flags: <defaults>
</compile_context>

<pallas_src>
import functools

import jax
import jax.numpy as jnp
from jax.experimental import pallas as pl
from jax.experimental.pallas import tpu as pltpu


def jtm_kernel(xu_ref, mode_ref, w_ref, out_ref):
    """One K-tile (lane-dense, transposed layout) of the JTM forward pass.

    xu_ref   : (nx+nu, TK) f32   [state^T ; action^T] for TK trajectories
    mode_ref : (1, TK)     i32   active dynamics mode per trajectory
    w_ref    : (nmodes*nx, nx+nu) f32  fused per-mode [A_m | B_m] weights
    out_ref  : (nx, TK)    f32   next_state^T
    """
    nx, tk = out_ref.shape
    nmodes = w_ref.shape[0] // nx

    xu = xu_ref[...]                                   # (nx+nu, TK)
    mode = mode_ref[...]                               # (1, TK) int32
    mode_f = mode.astype(jnp.float32)                  # (1, TK)

    # Single fused MXU matmul: all modes' next states at once.
    #   all_next[m*nx:(m+1)*nx, :] = A_m @ state^T + B_m @ action^T
    all_next = jnp.dot(w_ref[...], xu,
                       preferred_element_type=jnp.float32)   # (nmodes*nx, TK)

    # self.next_state[:] = state  (rows 0..nx of xu hold state^T).
    next_state = xu[:nx, :]                            # (nx, TK)

    # pad_state writes the mode value into the LAST state component
    # (last row in this transposed layout).
    row_is_last = (jax.lax.broadcasted_iota(jnp.int32, (nx, tk), 0) == nx - 1)

    # Short static unrolled select chain over the (few) modes.
    for idx in range(nmodes):
        nxt = all_next[idx * nx:(idx + 1) * nx, :]     # (nx, TK) static slice
        nxt = jnp.where(row_is_last, mode_f, nxt)      # padded[-1, :] = mode
        next_state = jnp.where(mode == idx, nxt, next_state)

    out_ref[...] = next_state                          # one full-tile store


def _pick_tk(K):
    """Largest lane-dense tile (<=1024) dividing K, preferring >=2 grid steps
    (keeps both TensorCores busy on v7x)."""
    candidates = [t for t in (1024, 512, 256, 128) if t <= K and K % t == 0]
    for t in candidates:
        if K // t >= 2:
            return t
    if candidates:
        return candidates[0]
    return K        # tiny / ragged K: single full-array block


@functools.partial(jax.jit, static_argnames=("tk",))
def jtm_forward(state_and_var, action, mode, A, B, *, tk=None):
    """JTM.forward.

    state_and_var : (K, 2*nx) f32  -- [state | variance]
    action        : (K, nu)   f32
    mode          : (K, 1)    int  -- self.mode (int8 in torch; any int ok)
    A             : (nmodes, nx, nx) f32  (zero-padded outside each mode_nx)
    B             : (nmodes, nx, nu) f32
    returns       : (K, 2*nx) f32  -- [next_state | std=0]
    """
    K, two_nx = state_and_var.shape
    nmodes, nx, _ = A.shape
    nu = action.shape[1]
    assert two_nx == 2 * nx

    if tk is None:
        tk = _pick_tk(K)
    assert K % tk == 0
    grid = (K // tk,)

    # --- layout plumbing (cheap XLA ops, done once outside the kernel) ------
    # Fused, pre-transposed weights: W[m*nx:(m+1)*nx] = [A_m | B_m].
    W = jnp.concatenate([A, B], axis=2).reshape(nmodes * nx, nx + nu)
    # Lane-dense transposed operands: trajectories (K) on the lane axis.
    xu_t = jnp.concatenate([state_and_var[:, :nx], action], axis=1).T  # (nx+nu, K)
    mode_row = mode.astype(jnp.int32).reshape(1, K)                    # (1, K)

    next_state_t = pl.pallas_call(
        jtm_kernel,
        out_shape=jax.ShapeDtypeStruct((nx, K), jnp.float32),
        grid_spec=pltpu.PrefetchScalarGridSpec(
            num_scalar_prefetch=0,
            grid=grid,
            in_specs=[
                pl.BlockSpec((nx + nu, tk), lambda i: (0, i)),
                pl.BlockSpec((1, tk), lambda i: (0, i)),
                # Weight slab: constant block index -> held resident in VMEM.
                pl.BlockSpec((nmodes * nx, nx + nu), lambda i: (0, 0)),
            ],
            out_specs=pl.BlockSpec((nx, tk), lambda i: (0, i)),
        ),
        compiler_params=pltpu.CompilerParams(
            dimension_semantics=("parallel",)),
    )(xu_t, mode_row, W)

    next_state = next_state_t.T                                        # (K, nx)
    # std = zeros, appended outside the kernel (free broadcast in XLA).
    return jnp.concatenate([next_state, jnp.zeros_like(next_state)], axis=1)


def jtm_reference(state_and_var, action, mode, A, B):
    """Pure-JAX reference matching the module semantics."""
    nmodes, nx, _ = A.shape
    state = state_and_var[:, :nx]
    next_state = state
    for idx in range(nmodes):
        nxt = state @ A[idx].T + action @ B[idx].T
        nxt = nxt.at[:, -1].set(mode[:, 0].astype(jnp.float32))
        next_state = jnp.where(mode == idx, nxt, next_state)
    return jnp.concatenate([next_state, jnp.zeros_like(next_state)], axis=1)


if __name__ == "__main__":
    # Small shapes: K trajectories, padded state dim nx (= 2*max simple-model
    # state dim in the original module), nu controls, nmodes simple models.
    K, nx, nu, nmodes = 256, 8, 2, 3
    mode_nx_list = [4, 6, 8]   # each simple model's (truncated) state dim <= nx

    key = jax.random.PRNGKey(0)
    k1, k2, k3, k4, k5 = jax.random.split(key, 5)

    state_and_var = jax.random.normal(k1, (K, 2 * nx), dtype=jnp.float32)
    action = jax.random.normal(k2, (K, nu), dtype=jnp.float32)
    mode = jax.random.randint(k3, (K, 1), 0, nmodes, dtype=jnp.int32)

    # Deterministic per-mode linear dynamics, zero-padded outside each mode's
    # mode_nx block so that truncate_state / pad_state fall out of the matmul.
    A = jnp.zeros((nmodes, nx, nx), dtype=jnp.float32)
    B = jnp.zeros((nmodes, nx, nu), dtype=jnp.float32)
    a_keys = jax.random.split(k4, nmodes)
    b_keys = jax.random.split(k5, nmodes)
    for idx, m_nx in enumerate(mode_nx_list):
        A_blk = 0.1 * jax.random.normal(a_keys[idx], (m_nx, m_nx), jnp.float32)
        B_blk = 0.1 * jax.random.normal(b_keys[idx], (m_nx, nu), jnp.float32)
        A = A.at[idx, :m_nx, :m_nx].set(A_blk)
        B = B.at[idx, :m_nx, :].set(B_blk)

    out = jtm_forward(state_and_var, action, mode, A, B)
    out = jax.block_until_ready(out)

    ref = jtm_reference(state_and_var, action, mode, A, B)
    assert out.shape == (K, 2 * nx)
    assert jnp.allclose(out, ref, atol=1e-5, rtol=1e-5), "kernel/reference mismatch"

    # TODO(synk): the original module's torch.tensor((K, nx)) next_state init
    # and state_and_var[:self.nx] row-slice are latent bugs; implemented the
    # documented (K x nx column-sliced) semantics instead.
    print("KERNEL_OK")
</pallas_src>

<mosaic_0001>
module attributes {stable_mosaic.version = 11 : i64} {
  func.func @jtm_kernel(%arg0: i32, %arg1: memref<10x128xf32, #tpu.memory_space<vmem>>, %arg2: memref<1x128xi32, #tpu.memory_space<vmem>>, %arg3: memref<24x10xf32, #tpu.memory_space<vmem>>, %arg4: memref<8x128xf32, #tpu.memory_space<vmem>>) attributes {dimension_semantics = [#tpu.dimension_semantics<parallel>], iteration_bounds = array<i64: 2>, scalar_prefetch = 0 : i64, scratch_operands = 0 : i64, tpu.core_type = #tpu.core_type<tc>, window_params = [{transform_indices = @transform_0, window_bounds = array<i64: 10, 128>}, {transform_indices = @transform_1, window_bounds = array<i64: 1, 128>}, {pipeline_mode = #tpu.pipeline_mode<synchronous>, transform_indices = @transform_2, window_bounds = array<i64: 24, 10>}, {transform_indices = @transform_3, window_bounds = array<i64: 8, 128>}]} {
    %c0 = arith.constant 0 : index
    %c0_0 = arith.constant 0 : index
    %0 = vector.load %arg1[%c0, %c0_0] : memref<10x128xf32, #tpu.memory_space<vmem>>, vector<10x128xf32>
    %c0_1 = arith.constant 0 : index
    %c0_2 = arith.constant 0 : index
    %1 = vector.load %arg2[%c0_1, %c0_2] : memref<1x128xi32, #tpu.memory_space<vmem>>, vector<1x128xi32>
    %2 = arith.sitofp %1 : vector<1x128xi32> to vector<1x128xf32>
    %c0_3 = arith.constant 0 : index
    %c0_4 = arith.constant 0 : index
    %3 = vector.load %arg3[%c0_3, %c0_4] : memref<24x10xf32, #tpu.memory_space<vmem>>, vector<24x10xf32>
    %cst = arith.constant dense<0.000000e+00> : vector<24x128xf32>
    %4 = tpu.matmul %3, %0, %cst {dimension_numbers = #tpu.dot_dimension_numbers<[1], [0], [0], [1], [0, 0, 1, 1], [], []>} : vector<24x10xf32>, vector<10x128xf32>, vector<24x128xf32> -> vector<24x128xf32>
    %5 = vector.extract_strided_slice %0 {offsets = [0, 0], sizes = [8, 128], strides = [1, 1]} : vector<10x128xf32> to vector<8x128xf32>
    %6 = tpu.iota {dimensions = array<i32: 0>} : vector<8x128xi32>
    %c7_i32 = arith.constant 7 : i32
    %7 = vector.broadcast %c7_i32 : i32 to vector<8x128xi32>
    %8 = arith.cmpi eq, %6, %7 : vector<8x128xi32>
    %9 = vector.extract_strided_slice %4 {offsets = [0, 0], sizes = [8, 128], strides = [1, 1]} : vector<24x128xf32> to vector<8x128xf32>
    %10 = vector.shape_cast %2 : vector<1x128xf32> to vector<1x128xf32>
    %11 = vector.broadcast %10 : vector<1x128xf32> to vector<8x128xf32>
    %12 = arith.select %8, %11, %9 : vector<8x128xi1>, vector<8x128xf32>
    %c0_i32 = arith.constant 0 : i32
    %13 = vector.broadcast %c0_i32 : i32 to vector<1x128xi32>
    %14 = arith.cmpi eq, %1, %13 : vector<1x128xi32>
    %15 = vector.shape_cast %14 : vector<1x128xi1> to vector<1x128xi1>
    %16 = vector.broadcast %15 : vector<1x128xi1> to vector<8x128xi1>
    %17 = arith.select %16, %12, %5 : vector<8x128xi1>, vector<8x128xf32>
    %18 = vector.extract_strided_slice %4 {offsets = [8, 0], sizes = [8, 128], strides = [1, 1]} : vector<24x128xf32> to vector<8x128xf32>
    %19 = vector.shape_cast %2 : vector<1x128xf32> to vector<1x128xf32>
    %20 = vector.broadcast %19 : vector<1x128xf32> to vector<8x128xf32>
    %21 = arith.select %8, %20, %18 : vector<8x128xi1>, vector<8x128xf32>
    %c1_i32 = arith.constant 1 : i32
    %22 = vector.broadcast %c1_i32 : i32 to vector<1x128xi32>
    %23 = arith.cmpi eq, %1, %22 : vector<1x128xi32>
    %24 = vector.shape_cast %23 : vector<1x128xi1> to vector<1x128xi1>
    %25 = vector.broadcast %24 : vector<1x128xi1> to vector<8x128xi1>
    %26 = arith.select %25, %21, %17 : vector<8x128xi1>, vector<8x128xf32>
    %27 = vector.extract_strided_slice %4 {offsets = [16, 0], sizes = [8, 128], strides = [1, 1]} : vector<24x128xf32> to vector<8x128xf32>
    %28 = vector.shape_cast %2 : vector<1x128xf32> to vector<1x128xf32>
    %29 = vector.broadcast %28 : vector<1x128xf32> to vector<8x128xf32>
    %30 = arith.select %8, %29, %27 : vector<8x128xi1>, vector<8x128xf32>
    %c2_i32 = arith.constant 2 : i32
    %31 = vector.broadcast %c2_i32 : i32 to vector<1x128xi32>
    %32 = arith.cmpi eq, %1, %31 : vector<1x128xi32>
    %33 = vector.shape_cast %32 : vector<1x128xi1> to vector<1x128xi1>
    %34 = vector.broadcast %33 : vector<1x128xi1> to vector<8x128xi1>
    %35 = arith.select %34, %30, %26 : vector<8x128xi1>, vector<8x128xf32>
    %c0_5 = arith.constant 0 : index
    %c0_6 = arith.constant 0 : index
    %36 = vector.load %arg4[%c0_5, %c0_6] : memref<8x128xf32, #tpu.memory_space<vmem>>, vector<8x128xf32>
    tpu.vector_store %arg4[%c0_5, %c0_6], %35 {strides = array<i32>} : memref<8x128xf32, #tpu.memory_space<vmem>>, vector<8x128xf32>,
    return
  }
  func.func @transform_0(%arg0: i32) -> (i32, i32) {
    %c0_i32 = arith.constant 0 : i32
    %c0_i32_0 = arith.constant 0 : i32
    return %c0_i32, %arg0 : i32, i32
  }
  func.func @transform_1(%arg0: i32) -> (i32, i32) {
    %c0_i32 = arith.constant 0 : i32
    %c0_i32_0 = arith.constant 0 : i32
    return %c0_i32, %arg0 : i32, i32
  }
  func.func @transform_2(%arg0: i32) -> (i32, i32) {
    %c0_i32 = arith.constant 0 : i32
    %c0_i32_0 = arith.constant 0 : i32
    %c0_i32_1 = arith.constant 0 : i32
    return %c0_i32, %c0_i32_0 : i32, i32
  }
  func.func @transform_3(%arg0: i32) -> (i32, i32) {
    %c0_i32 = arith.constant 0 : i32
    %c0_i32_0 = arith.constant 0 : i32
    return %c0_i32, %arg0 : i32, i32
  }
}

</mosaic_0001>

<bundles_post_ra>
// kernel: jtm_forward.1
= control target key start
LH: loop header
LB: loop body
LE: loop exit
PB: predicated region body
PF: predicated region fallthrough
CT: control target
= control target key end

     0   :  { %s544_s12 = smov 0   ;;  %s546_s13 = smov 0   ;;  %s620_s0 = inlined_call_operand.vmem [shape: f32[10,256], index: 0, kind: input, shape index: {}]   ;;  %s621_s1 = inlined_call_operand.vmem [shape: s32[1,256], index: 1, kind: input, shape index: {}]   ;;  %s622_s2 = inlined_call_operand.vmem [shape: f32[24,10], index: 2, kind: input, shape index: {}]   ;;  %s623_s3 = inlined_call_operand.vmem [shape: f32[8,256], index: 3, kind: output, shape index: {}]  }
   0x1   :  { %s548_s14 = smov 0  }
   0x2 LB: > { %s427_s15 = sadd.s32 4294967295, %s517_s14   ;;  %s561_s16 = sadd.s32 1, %s517_s14   ;;  %s517_s14 = sphi %s548_s14, %s626_s14   ;;  %s513_s13 = sphi %s546_s13, %s625_s13   ;;  %s509_s12 = sphi %s544_s12, %s624_s12  }
   0x3   : > { %s17_s17 = ssub.s32 %s517_s14, %s561_s16  ;;  %s20_s18 = sadd.s32 1, %s513_s13 }
   0x4   : > { %p18_p0 = scmp.eq.s32.totalorder %s17_s17, 0  ;;  %p27_p1 = scmp.ne.s32.totalorder %s513_s13, %s509_s12 }
   0x5   : > { %p28_p2 = scmp.eq.s32.totalorder %s517_s14, 0  ;;  %p430_p4 = scmp.ge.s32.totalorder %s517_s14, 2 }
   0x6   : > { %s570_s19 = scalar_select %p18_p0, %s513_s13, %s20_s18  }
   0x7   : > { %p29_p3 = por %p28_p2, %p27_p1  ;;  %129 = sbr.rel (%p430_p4) target bundleno = 21 (0x15), region = 20 }
   0xe   : > { %132 = sbr.rel (!%p29_p3) target bundleno = 21 (0x15), region = 24  ;;  %s134_s20 = sand.u32 (%p29_p3), 1, %s513_s13  }
   0xf   : > { %s432_s21 = sshll.u32 (%p29_p3), %s517_s14, 3  ;;  %s431_s22 = sshll.u32 (%p29_p3), %s134_s20, 4 }
  0x10   : > { %s138_s25 = scalar_lea.vmem (%p29_p3), %s620_s0, %s432_s21  ;;  %s136_s26 = scalar_lea.vmem (%p29_p3), [#allocation2], %s431_s22 }
  0x11   : > { %v168_v0 = vld [vmem:[%s138_s25] sm:$0xff] (%p29_p3)  ;;  %v170_v1 = vld [vmem:[%s138_s25 + $0x10] sm:$0xff] (%p29_p3) }
  0x12   : > { %169 = vst [vmem:[%s136_s26] sm:$0xff] (%p29_p3), %v168_v0  ;;  %171 = vst [vmem:[%s136_s26 + $0x8] sm:$0xff] (%p29_p3), %v170_v1 }
  0x15 PF: > { %p433_p5 = scmp.ge.s32.totalorder %s517_s14, 1  ;;  %p182_p6 = scmp.lt.s32.totalorder %s517_s14, 3 }
  0x17   : > { %p183_p7 = pnand %p433_p5, %p182_p6 }
  0x18   : > { %s189_s27 = sand.u32 (!%p183_p7), 1, %s509_s12   ;;  %vm238_vm0 = vcmask (!%p183_p7), 1041408   ;;  %v519_v2 = vmov (!%p183_p7), 0.0|0.0   ;;  %vm520_vm1 = vmmov (!%p183_p7), 0   ;;  %v521_v3 = vmov (!%p183_p7), 0.0   ;;  %v225_v7 = vld [vmem:[%s622_s2] sm:$0xff] (!%p183_p7) }
  0x19   : > { %186 = sbr.rel (%p183_p7) target bundleno = 252 (0xfc), region = 66  ;;  %460 = vmatprep.subr.bf16.mxu0 (!%p183_p7), %v519_v2  ;;  %464 = vmatprep.subr.bf16.mxu1 (!%p183_p7), %v519_v2  ;;  %s434_s28 = sshll.u32 (!%p183_p7), %s189_s27, 4  ;;  %vm522_vm2 = vmmov (!%p183_p7), 1   ;;  %vm228_vm4 = vcmask (!%p183_p7), 80896   ;;  %v226_v8 = vld [vmem:[%s622_s2 + $0x8] sm:$0xff] (!%p183_p7)  ;;  %v227_v9 = vld [vmem:[%s622_s2 + $0x10] sm:$0xff] (!%p183_p7)  ;;  %v322_v10 = vlaneseq (!%p183_p7) }
  0x1a   : > { %451 = vmatprep.mubr.msk.f32.mxu0 (!%p183_p7), %vm520_vm1, %v521_v3  ;;  %454 = vmatprep.mubr.msk.f32.mxu1 (!%p183_p7), %vm520_vm1, %v521_v3  ;;  %s191_s29 = scalar_lea.vmem (!%p183_p7), [#allocation2], %s434_s28  ;;  %vm462_vm3 = vmpackc.low (!%p183_p7), %vm238_vm0, %vm522_vm2  ;;  %p214_p8 = scmp.lt.s32.totalorder (!%p183_p7), %s427_s15, 1  ;;  %v523_v14 = vmov (!%p183_p7), 0  }
  0x1b   : > { %v221_v4 = vld [vmem:[%s191_s29] sm:$0xff] (!%p183_p7)  ;;  %v222_v5 = vld [vmem:[%s191_s29 + $0x8] sm:$0x3] (!%p183_p7)  ;;  %v323_v12 = vshrl.u32 (!%p183_p7), %v322_v10, 7 }
  0x1c   : > { %v461_v6 = vpack.c.bf16 (!%p183_p7), %v222_v5, %v221_v4 }
  0x1d   : > { %v328_v13 = vsub.s32 (!%p183_p7), 0, %v323_v12  ;;  %vm324_vm8 = vcmp.eq.s32.totalorder (!%p183_p7), %v323_v12, 7 }
  0x1e   : > { %463 = vmatpush3.bf16.msk.msra.mxu0 (!%p183_p7), %vm462_vm3, %v461_v6  ;;  %465 = vmatpush3.bf16.msk.msra.mxu1 (!%p183_p7), %vm462_vm3, %v461_v6 }
  0x20   : > { %s628_s15 = smov (!%p214_p8, %s427_s15), 1 }
  0x21   : > { %452 = vmatmul.mubr.msk.f32.vlgmr.msra.gmra.mrb[0].mxu0 %vm228_vm4, %v225_v7  ;;  %455 = vmatmul.mubr.msk.f32.vlgmr.msra.gmra.mrb[0].mxu1 %vm228_vm4, %v226_v8  ;;  %s216_s11 = scalar_lea.vmem %s621_s1, %s628_s15  ;;  %s435_s12 = sshll.u32 %s628_s15, 3 }
  0x22   : > { %457 = vmatprep.mubr.msk.f32.mxu1 %vm520_vm1, %v521_v3  ;;  %v223_v11 = vld [vmem:[%s216_s11] sm:$0x1]  ;;  %s220_s18 = scalar_lea.vmem %s623_s3, %s435_s12 }
  0x23   : > { %vm332_vm5 = vcmp.eq.s32.totalorder %v223_v11, 0  ;;  %vm341_vm6 = vcmp.eq.s32.totalorder %v223_v11, 1  ;;  %v224_v16 = vcvt.s32.f32 %v223_v11  ;;  %vm350_vm7 = vcmp.eq.s32.totalorder %v223_v11, 2 }
  0x24   : > { %v333_v15 = vsel %vm332_vm5, 1, %v523_v14  ;;  %v342_v17 = vsel %vm341_vm6, 1, %v523_v14  ;;  %v351_v20 = vsel %vm350_vm7, 1, %v523_v14 }
  0x25   : > { %458 = vmatmul.mubr.msk.f32.gmra.mrb[2].mxu1 %vm228_vm4, %v227_v9  ;;  %v337_v18 = vrot.slane %v333_v15, %v328_v13  ;;  %v346_v19 = vrot.slane %v342_v17, %v328_v13  ;;  %v329_v21 = vrot.slane %v224_v16, %v328_v13  ;;  %v355_v22 = vrot.slane %v351_v20, %v328_v13 }
  0x27   : > { %vm338_vm9 = vcmp.eq.s32.totalorder %v337_v18, 1  ;;  %vm347_vm10 = vcmp.eq.s32.totalorder %v346_v19, 1  ;;  %vm356_vm11 = vcmp.eq.s32.totalorder %v355_v22, 1 }
  0xf4   : > { %v308_v23 = vpop.f32.mrb[0].mxu0  ;;  %v313_v24 = vpop.f32.mrb[0].mxu1 }
  0xf5   : > { %v331_v25 = vsel %vm324_vm8, %v329_v21, %v308_v23  ;;  %v340_v26 = vsel %vm324_vm8, %v329_v21, %v313_v24  ;;  %v456_v27 = vpop.f32.mrb[1].mxu1  ;;  %v453_v28 = vpop.f32.mrb[1].mxu0 }
  0xf6   : > { %v339_v29 = vsel %vm338_vm9, %v331_v25, %v221_v4 }
  0xf7   : > { %v348_v30 = vsel %vm347_vm10, %v340_v26, %v339_v29 }
  0xf8   : > { %v318_v31 = vpop.f32.mrb[2].mxu1 }
  0xf9   : > { %v349_v32 = vsel %vm324_vm8, %v329_v21, %v318_v31  ;;  %v459_v33 = vpop.f32.mrb[3].mxu1 }
  0xfa   : > { %v357_v34 = vsel %vm356_vm11, %v349_v32, %v348_v30 }
  0xfb   : > { %358 = vst [vmem:[%s220_s18] sm:$0xff] %v357_v34 }
  0xfc PF: > { %p10_p9 = scmp.ge.s32.totalorder %s561_s16, 4   ;;  %s624_s12 = smov %s513_s13 }
  0xfd   : > { %s625_s13 = smov %s570_s19  ;;  %s626_s14 = smov %s561_s16 }
  0xfe   :  { %12 = sbr.rel (!%p10_p9) target bundleno = 2 (0x2), region = 108 }

</bundles_post_ra>
